<compile_context>
chip_gen: v5e
topology: v5e:2x2
jax: 0.10.0
libtpu: 0.0.40
codegen_flags: <defaults>
</compile_context>

<pallas_src>
import functools
import math

import jax
import jax.numpy as jnp
from jax.experimental import pallas as pl
from jax.experimental.pallas import tpu as pltpu


# ----------------------------------------------------------------------------
# Activations (ACT2FN subset). GPT-2 default is "gelu_new".
# ----------------------------------------------------------------------------
def _gelu_new(x):
    c = math.sqrt(2.0 / math.pi)
    return 0.5 * x * (1.0 + jnp.tanh(c * (x + 0.044715 * x * x * x)))


_ACTIVATIONS = {
    None: lambda x: x,
    "gelu_new": _gelu_new,
    "gelu": lambda x: jax.nn.gelu(x, approximate=False),
    "relu": lambda x: jnp.maximum(x, 0.0),
}


def _round_up(x, m):
    return ((x + m - 1) // m) * m


# ----------------------------------------------------------------------------
# Fused MLP kernel.
#   grid = (M/tm, n_state/ts);  j = program_id(1) walks the c_proj reduction.
#   Per step:   h_j  = act(x_tile @ W1[:, j*ts:(j+1)*ts] + b1[j])   (in VMEM)
#               acc += h_j @ W2[j*ts:(j+1)*ts, :]
#   Finalize:   out  = acc + b2
# ----------------------------------------------------------------------------
def _mlp_kernel(x_ref, w1_ref, b1_ref, w2_ref, b2_ref, o_ref, acc_ref, *,
                activation, mxu_dtype):
    j = pl.program_id(1)

    @pl.when(j == 0)
    def _init():
        acc_ref[...] = jnp.zeros_like(acc_ref)

    # --- c_fc slice: (tm, nx) @ (nx, ts) -> (tm, ts), f32 accumulate on MXU ---
    x = x_ref[...]
    w1 = w1_ref[...]
    if mxu_dtype is not None:
        x = x.astype(mxu_dtype)
        w1 = w1.astype(mxu_dtype)
    h = jnp.dot(x, w1, preferred_element_type=jnp.float32)
    h = h + b1_ref[...].astype(jnp.float32)
    h = _ACTIVATIONS[activation](h)          # f32 epilogue (tanh -> EUP)

    # --- c_proj partial: (tm, ts) @ (ts, nx) accumulated into VMEM scratch ---
    w2 = w2_ref[...]
    if mxu_dtype is not None:
        h = h.astype(mxu_dtype)
        w2 = w2.astype(mxu_dtype)
    acc_ref[...] += jnp.dot(h, w2, preferred_element_type=jnp.float32)

    @pl.when(j == pl.num_programs(1) - 1)
    def _finalize():
        out = acc_ref[...] + b2_ref[...].astype(jnp.float32)
        o_ref[...] = out.astype(o_ref.dtype)


# ----------------------------------------------------------------------------
# Wrapper: MLP.forward (eval mode: dropout == identity)
# ----------------------------------------------------------------------------
def mlp_forward(x, params, *, activation="gelu_new",
                mxu_dtype=jnp.bfloat16,        # None -> exact f32 MXU path
                tm=512, tns=512,               # M tile / n_state tile
                vmem_limit_bytes=48 * 1024 * 1024):
    """x: (B, T, nx).  c_fc: nx -> n_state, c_proj: n_state -> nx."""
    B, T, nx = x.shape
    w1, b1 = params["c_fc_w"], params["c_fc_b"]
    w2, b2 = params["c_proj_w"], params["c_proj_b"]
    n_state = w1.shape[1]
    assert w1.shape == (nx, n_state)
    assert w2.shape == (n_state, nx)
    assert b1.shape == (n_state,) and b2.shape == (nx,)

    M = B * T
    x2d = x.reshape(M, nx)

    # ---- M tiling: sublane-aligned, bounded tile; zero-pad ragged rows ----
    tm_eff = min(tm, _round_up(M, 8))
    m_pad = _round_up(M, tm_eff)
    if m_pad != M:
        x2d = jnp.pad(x2d, ((0, m_pad - M), (0, 0)))

    # ---- n_state tiling: lane-aligned, bounded tile; zero-pad ragged cols ----
    ts_eff = min(tns, _round_up(n_state, 128))
    ns_pad = _round_up(n_state, ts_eff)
    if ns_pad != n_state:
        pad = ns_pad - n_state
        w1 = jnp.pad(w1, ((0, 0), (0, pad)))
        b1 = jnp.pad(b1, (0, pad))
        w2 = jnp.pad(w2, ((0, pad), (0, 0)))

    b1_2d = b1.reshape(1, ns_pad)
    b2_2d = b2.reshape(1, nx)

    grid = (m_pad // tm_eff, ns_pad // ts_eff)
    kernel = functools.partial(_mlp_kernel, activation=activation,
                               mxu_dtype=mxu_dtype)

    out = pl.pallas_call(
        kernel,
        out_shape=jax.ShapeDtypeStruct((m_pad, nx), x.dtype),
        grid_spec=pltpu.PrefetchScalarGridSpec(
            num_scalar_prefetch=0,
            grid=grid,
            in_specs=[
                # x tile: constant along j -> stays resident in VMEM
                pl.BlockSpec((tm_eff, nx), lambda i, j: (i, 0)),
                # W1 column slab / b1 slice: stream along j
                # (add pipeline_mode=pl.Buffered(3) here if DMA-exposed)
                pl.BlockSpec((nx, ts_eff), lambda i, j: (0, j)),
                pl.BlockSpec((1, ts_eff), lambda i, j: (0, j)),
                # W2 row slab: stream along j
                pl.BlockSpec((ts_eff, nx), lambda i, j: (j, 0)),
                # b2: tiny, resident
                pl.BlockSpec((1, nx), lambda i, j: (0, 0)),
            ],
            # output tile constant along j -> written back once per i
            out_specs=pl.BlockSpec((tm_eff, nx), lambda i, j: (i, 0)),
            scratch_shapes=[pltpu.VMEM((tm_eff, nx), jnp.float32)],
        ),
        compiler_params=pltpu.CompilerParams(
            dimension_semantics=("parallel", "arbitrary"),
            vmem_limit_bytes=vmem_limit_bytes,
        ),
    )(x2d, w1, b1_2d, w2, b2_2d)

    if m_pad != M:
        out = out[:M]
    # TODO(synk): resid dropout is identity in eval mode; no training-mode RNG.
    return out.reshape(B, T, nx)


# ----------------------------------------------------------------------------
# Pure-JAX reference (mirrors the PyTorch forward, eval mode).
# `mxu_dtype` mimics the kernel's operand casting so comparisons are exact.
# ----------------------------------------------------------------------------
def mlp_reference(x, params, *, activation="gelu_new", mxu_dtype=None):
    B, T, nx = x.shape
    x2d = x.reshape(B * T, nx)
    w1, w2 = params["c_fc_w"], params["c_proj_w"]
    a, w1c = (x2d, w1) if mxu_dtype is None else (x2d.astype(mxu_dtype),
                                                  w1.astype(mxu_dtype))
    h = jnp.dot(a, w1c, preferred_element_type=jnp.float32)
    h = h + params["c_fc_b"].astype(jnp.float32)
    h = _ACTIVATIONS[activation](h)
    hc, w2c = (h, w2) if mxu_dtype is None else (h.astype(mxu_dtype),
                                                 w2.astype(mxu_dtype))
    h2 = jnp.dot(hc, w2c, preferred_element_type=jnp.float32)
    h2 = h2 + params["c_proj_b"].astype(jnp.float32)
    return h2.reshape(B, T, nx).astype(x.dtype)


def _make_params(key, nx, n_state, dtype=jnp.float32):
    k_fw, k_fb, k_pw, k_pb = jax.random.split(key, 4)
    return {
        "c_fc_w": 0.02 * jax.random.normal(k_fw, (nx, n_state), dtype),
        "c_fc_b": 0.01 * jax.random.normal(k_fb, (n_state,), dtype),
        "c_proj_w": 0.02 * jax.random.normal(k_pw, (n_state, nx), dtype),
        "c_proj_b": 0.01 * jax.random.normal(k_pb, (nx,), dtype),
    }


if __name__ == "__main__":
    ACT = "gelu_new"
    key = jax.random.PRNGKey(0)
    k_x1, k_p1, k_x2, k_p2 = jax.random.split(key, 4)

    # ------------------------------------------------------------------
    # Test 1: module-consistent small config (n_embd=32, n_state=4*n_embd,
    # batch=2, seq=8), exact f32 MXU path, tight tolerance.
    # ------------------------------------------------------------------
    B, T, NX = 2, 8, 32
    N_STATE = 4 * NX
    params1 = _make_params(k_p1, NX, N_STATE)
    x1 = jax.random.normal(k_x1, (B, T, NX), jnp.float32)

    out1 = jax.block_until_ready(
        mlp_forward(x1, params1, activation=ACT, mxu_dtype=None))
    ref1 = mlp_reference(x1, params1, activation=ACT)
    assert out1.shape == (B, T, NX)
    assert jnp.allclose(out1, ref1, atol=1e-4, rtol=1e-4), float(
        jnp.max(jnp.abs(out1 - ref1)))

    # ------------------------------------------------------------------
    # Test 2: multi-tile grid (exercises the accumulator / pl.when path and
    # the M-padding path) with the default bf16 MXU operands.
    #   M = 2*100 = 200 -> padded to 256, tm=128 -> 2 M-tiles
    #   n_state = 512, ts=256 -> 2 reduction steps
    # ------------------------------------------------------------------
    B2, T2, NX2 = 2, 100, 128
    NS2 = 4 * NX2
    params2 = _make_params(k_p2, NX2, NS2)
    x2 = jax.random.normal(k_x2, (B2, T2, NX2), jnp.float32)

    out2 = jax.block_until_ready(
        mlp_forward(x2, params2, activation=ACT,
                    mxu_dtype=jnp.bfloat16, tm=128, tns=256))
    assert out2.shape == (B2, T2, NX2)
    # Same-numerics reference (bf16 operands, f32 accumulate): tight.
    ref2_bf16 = mlp_reference(x2, params2, activation=ACT,
                              mxu_dtype=jnp.bfloat16)
    assert jnp.allclose(out2, ref2_bf16, atol=5e-4, rtol=5e-4), float(
        jnp.max(jnp.abs(out2 - ref2_bf16)))
    # Sanity vs pure-f32 math: loose (bf16 operand rounding only).
    ref2_f32 = mlp_reference(x2, params2, activation=ACT)
    assert jnp.allclose(out2, ref2_f32, atol=2e-2, rtol=2e-2), float(
        jnp.max(jnp.abs(out2 - ref2_f32)))

    print("KERNEL_OK")
</pallas_src>

<mosaic_0001>
module attributes {stable_mosaic.version = 11 : i64} {
  func.func @_mlp_kernel(%arg0: i32, %arg1: i32, %arg2: memref<16x32xf32, #tpu.memory_space<vmem>>, %arg3: memref<32x128xf32, #tpu.memory_space<vmem>>, %arg4: memref<1x128xf32, #tpu.memory_space<vmem>>, %arg5: memref<128x32xf32, #tpu.memory_space<vmem>>, %arg6: memref<1x32xf32, #tpu.memory_space<vmem>>, %arg7: memref<16x32xf32, #tpu.memory_space<vmem>>, %arg8: memref<16x32xf32, #tpu.memory_space<vmem>>) attributes {dimension_semantics = [#tpu.dimension_semantics<parallel>, #tpu.dimension_semantics<arbitrary>], iteration_bounds = array<i64: 1, 1>, scalar_prefetch = 0 : i64, scratch_operands = 1 : i64, tpu.core_type = #tpu.core_type<tc>, window_params = [{transform_indices = @transform_0, window_bounds = array<i64: 16, 32>}, {transform_indices = @transform_1, window_bounds = array<i64: 32, 128>}, {transform_indices = @transform_2, window_bounds = array<i64: 1, 128>}, {transform_indices = @transform_3, window_bounds = array<i64: 128, 32>}, {pipeline_mode = #tpu.pipeline_mode<synchronous>, transform_indices = @transform_4, window_bounds = array<i64: 1, 32>}, {transform_indices = @transform_5, window_bounds = array<i64: 16, 32>}]} {
    %c0_i32 = arith.constant 0 : i32
    %0 = arith.cmpi eq, %arg1, %c0_i32 : i32
    %1 = arith.extui %0 : i1 to i32
    %c0_i32_0 = arith.constant 0 : i32
    %2 = arith.cmpi ne, %1, %c0_i32_0 : i32
    scf.if %2 {
      %cst_19 = arith.constant 0.000000e+00 : f32
      %30 = vector.broadcast %cst_19 : f32 to vector<16x32xf32>
      %c0_20 = arith.constant 0 : index
      %c0_21 = arith.constant 0 : index
      %31 = vector.load %arg8[%c0_20, %c0_21] : memref<16x32xf32, #tpu.memory_space<vmem>>, vector<16x32xf32>
      tpu.vector_store %arg8[%c0_20, %c0_21], %30 {strides = array<i32>} : memref<16x32xf32, #tpu.memory_space<vmem>>, vector<16x32xf32>,
    } else {
    }
    %c0 = arith.constant 0 : index
    %c0_1 = arith.constant 0 : index
    %3 = vector.load %arg2[%c0, %c0_1] : memref<16x32xf32, #tpu.memory_space<vmem>>, vector<16x32xf32>
    %c0_2 = arith.constant 0 : index
    %c0_3 = arith.constant 0 : index
    %4 = vector.load %arg3[%c0_2, %c0_3] : memref<32x128xf32, #tpu.memory_space<vmem>>, vector<32x128xf32>
    %cst = arith.constant dense<0.000000e+00> : vector<16x128xf32>
    %5 = tpu.matmul %3, %4, %cst {dimension_numbers = #tpu.dot_dimension_numbers<[1], [0], [0], [1], [0, 0, 1, 1], [], []>} : vector<16x32xf32>, vector<32x128xf32>, vector<16x128xf32> -> vector<16x128xf32>
    %c0_4 = arith.constant 0 : index
    %c0_5 = arith.constant 0 : index
    %6 = vector.load %arg4[%c0_4, %c0_5] : memref<1x128xf32, #tpu.memory_space<vmem>>, vector<1x128xf32>
    %7 = vector.broadcast %6 : vector<1x128xf32> to vector<16x128xf32>
    %8 = arith.addf %5, %7 : vector<16x128xf32>
    %cst_6 = arith.constant 5.000000e-01 : f32
    %9 = vector.broadcast %cst_6 : f32 to vector<16x128xf32>
    %10 = arith.mulf %9, %8 : vector<16x128xf32>
    %cst_7 = arith.constant 4.471500e-02 : f32
    %11 = vector.broadcast %cst_7 : f32 to vector<16x128xf32>
    %12 = arith.mulf %11, %8 : vector<16x128xf32>
    %13 = arith.mulf %12, %8 : vector<16x128xf32>
    %14 = arith.mulf %13, %8 : vector<16x128xf32>
    %15 = arith.addf %8, %14 : vector<16x128xf32>
    %cst_8 = arith.constant 0.797884583 : f32
    %16 = vector.broadcast %cst_8 : f32 to vector<16x128xf32>
    %17 = arith.mulf %16, %15 : vector<16x128xf32>
    %18 = math.tanh %17 : vector<16x128xf32>
    %cst_9 = arith.constant 1.000000e+00 : f32
    %19 = vector.broadcast %cst_9 : f32 to vector<16x128xf32>
    %20 = arith.addf %19, %18 : vector<16x128xf32>
    %21 = arith.mulf %10, %20 : vector<16x128xf32>
    %c0_10 = arith.constant 0 : index
    %c0_11 = arith.constant 0 : index
    %22 = vector.load %arg5[%c0_10, %c0_11] : memref<128x32xf32, #tpu.memory_space<vmem>>, vector<128x32xf32>
    %c0_12 = arith.constant 0 : index
    %c0_13 = arith.constant 0 : index
    %23 = vector.load %arg8[%c0_12, %c0_13] : memref<16x32xf32, #tpu.memory_space<vmem>>, vector<16x32xf32>
    %cst_14 = arith.constant dense<0.000000e+00> : vector<16x32xf32>
    %24 = tpu.matmul %21, %22, %cst_14 {dimension_numbers = #tpu.dot_dimension_numbers<[1], [0], [0], [1], [0, 0, 1, 1], [], []>} : vector<16x128xf32>, vector<128x32xf32>, vector<16x32xf32> -> vector<16x32xf32>
    %25 = arith.addf %23, %24 : vector<16x32xf32>
    %c0_15 = arith.constant 0 : index
    %c0_16 = arith.constant 0 : index
    %26 = vector.load %arg8[%c0_15, %c0_16] : memref<16x32xf32, #tpu.memory_space<vmem>>, vector<16x32xf32>
    tpu.vector_store %arg8[%c0_15, %c0_16], %25 {strides = array<i32>} : memref<16x32xf32, #tpu.memory_space<vmem>>, vector<16x32xf32>,
    %c0_i32_17 = arith.constant 0 : i32
    %27 = arith.cmpi eq, %arg1, %c0_i32_17 : i32
    %28 = arith.extui %27 : i1 to i32
    %c0_i32_18 = arith.constant 0 : i32
    %29 = arith.cmpi ne, %28, %c0_i32_18 : i32
    scf.if %29 {
      %c0_19 = arith.constant 0 : index
      %c0_20 = arith.constant 0 : index
      %30 = vector.load %arg8[%c0_19, %c0_20] : memref<16x32xf32, #tpu.memory_space<vmem>>, vector<16x32xf32>
      %c0_21 = arith.constant 0 : index
      %c0_22 = arith.constant 0 : index
      %31 = vector.load %arg6[%c0_21, %c0_22] : memref<1x32xf32, #tpu.memory_space<vmem>>, vector<1x32xf32>
      %32 = vector.broadcast %31 : vector<1x32xf32> to vector<16x32xf32>
      %33 = arith.addf %30, %32 : vector<16x32xf32>
      %c0_23 = arith.constant 0 : index
      %c0_24 = arith.constant 0 : index
      %34 = vector.load %arg7[%c0_23, %c0_24] : memref<16x32xf32, #tpu.memory_space<vmem>>, vector<16x32xf32>
      tpu.vector_store %arg7[%c0_23, %c0_24], %33 {strides = array<i32>} : memref<16x32xf32, #tpu.memory_space<vmem>>, vector<16x32xf32>,
    } else {
    }
    return
  }
  func.func @transform_0(%arg0: i32, %arg1: i32) -> (i32, i32) {
    %c0_i32 = arith.constant 0 : i32
    %c0_i32_0 = arith.constant 0 : i32
    return %arg0, %c0_i32 : i32, i32
  }
  func.func @transform_1(%arg0: i32, %arg1: i32) -> (i32, i32) {
    %c0_i32 = arith.constant 0 : i32
    %c0_i32_0 = arith.constant 0 : i32
    return %c0_i32, %arg1 : i32, i32
  }
  func.func @transform_2(%arg0: i32, %arg1: i32) -> (i32, i32) {
    %c0_i32 = arith.constant 0 : i32
    %c0_i32_0 = arith.constant 0 : i32
    return %c0_i32, %arg1 : i32, i32
  }
  func.func @transform_3(%arg0: i32, %arg1: i32) -> (i32, i32) {
    %c0_i32 = arith.constant 0 : i32
    %c0_i32_0 = arith.constant 0 : i32
    return %arg1, %c0_i32 : i32, i32
  }
  func.func @transform_4(%arg0: i32, %arg1: i32) -> (i32, i32) {
    %c0_i32 = arith.constant 0 : i32
    %c0_i32_0 = arith.constant 0 : i32
    %c0_i32_1 = arith.constant 0 : i32
    return %c0_i32, %c0_i32_0 : i32, i32
  }
  func.func @transform_5(%arg0: i32, %arg1: i32) -> (i32, i32) {
    %c0_i32 = arith.constant 0 : i32
    %c0_i32_0 = arith.constant 0 : i32
    return %arg0, %c0_i32 : i32, i32
  }
}

</mosaic_0001>

<bundles_post_ra>
// kernel: tpu_custom_call.1
= control target key start
LH: loop header
LB: loop body
LE: loop exit
PB: predicated region body
PF: predicated region fallthrough
CT: control target
= control target key end

     0   :  { %s333_s0 = inlined_call_operand.vmem [shape: f32[16,32], index: 0, kind: input, shape index: {}]   ;;  %s334_s1 = inlined_call_operand.vmem [shape: f32[32,128], index: 1, kind: input, shape index: {}]   ;;  %s335_s2 = inlined_call_operand.vmem [shape: f32[1,128], index: 2, kind: input, shape index: {}]   ;;  %s336_s3 = inlined_call_operand.vmem [shape: f32[128,32], index: 3, kind: input, shape index: {}]   ;;  %s337_s4 = inlined_call_operand.vmem [shape: f32[1,32], index: 4, kind: input, shape index: {}]   ;;  %s338_s5 = inlined_call_operand.hbm [shape: f32[16,32], index: 5, kind: output, shape index: {}]  }
   0x1   :  { %v33_v0 = vld [vmem:[%s334_s1 + $0x18] sm:$0xff]  ;;  %v32_v1 = vld [vmem:[%s334_s1 + $0x10] sm:$0xff]  ;;  %v31_v2 = vld [vmem:[%s334_s1 + $0x8] sm:$0xff] }
   0x2   :  { %57 = vmatpush.msra.mxu0 %v33_v0  ;;  %v101_v3 = vld [vmem:[%s336_s3 + $0x78] sm:$0xff]  ;;  %v100_v4 = vld [vmem:[%s336_s3 + $0x70] sm:$0xff]  ;;  %v30_v5 = vld [vmem:[%s334_s1] sm:$0xff] }
   0x3   :  { %104 = vmatpush.msra.mxu1 %v101_v3  ;;  %v99_v6 = vld [vmem:[%s336_s3 + $0x68] sm:$0xff]  ;;  %164 = vmatpush.msra.mxu2 %v101_v3 }
   0x4   :  { %58 = vmatpush.msra.mxu0 %v32_v1 }
   0x5   :  { %10 = vsyncpa [#allocation4], 0  ;;  %vm25_vm0 = vcmask 261120   ;;  %v28_v7 = vld [vmem:[%s333_s0] sm:$0xff]  ;;  %105 = vmatpush.msra.mxu1 %v100_v4  ;;  %165 = vmatpush.msra.mxu2 %v100_v4  ;;  %v29_v9 = vld [vmem:[%s333_s0 + $0x8] sm:$0xff]  ;;  %v216_v25 = vmov 0.0  }
   0x6   :  { %59 = vmatpush.msra.mxu0 %v31_v2  ;;  %v98_v8 = vld [vmem:[%s336_s3 + $0x60] sm:$0xff]  ;;  %v97_v10 = vld [vmem:[%s336_s3 + $0x58] sm:$0xff]  ;;  %v96_v11 = vld [vmem:[%s336_s3 + $0x50] sm:$0xff]  ;;  %26 = vst.msk [vmem:[#allocation2] sm:$0xff] %vm25_vm0, %v216_v25  ;;  %s217_s11 = smov [#allocation3]   ;;  %s150_s15 = sshll.u32 %s338_s5, 4  ;;  %s151_s15 = int_to_ptr.hbm [resolvable:$true] %s150_s15 }
   0x7   :  { %106 = vmatpush.msra.mxu1 %v99_v6  ;;  %166 = vmatpush.msra.mxu2 %v99_v6  ;;  %v95_v12 = vld [vmem:[%s336_s3 + $0x48] sm:$0xff]  ;;  %v94_v13 = vld [vmem:[%s336_s3 + $0x40] sm:$0xff]  ;;  %v93_v14 = vld [vmem:[%s336_s3 + $0x38] sm:$0xff]  ;;  %27 = vst.msk [vmem:[#allocation2 + $0x8] sm:$0xff] %vm25_vm0, %v216_v25  ;;  %s148_s12 = sshll.u32 %s217_s11, 4  ;;  %s219_s16 = smov 8   ;;  %s149_s12 = int_to_ptr.vmem [resolvable:$true] %s148_s12 }
   0x8   :  { %60 = vmatpush.msra.mxu0 %v30_v5  ;;  %v92_v15 = vld [vmem:[%s336_s3 + $0x30] sm:$0xff]  ;;  %v91_v16 = vld [vmem:[%s336_s3 + $0x28] sm:$0xff]  ;;  %v90_v17 = vld [vmem:[%s336_s3 + $0x20] sm:$0xff] }
   0x9   :  { %162 = vmatmul.msk.f32.vlgmr.msra.gmra.mxu0 %vm25_vm0, %v28_v7  ;;  %107 = vmatpush.msra.mxu1 %v98_v8  ;;  %v89_v18 = vld [vmem:[%s336_s3 + $0x18] sm:$0xff]  ;;  %v88_v19 = vld [vmem:[%s336_s3 + $0x10] sm:$0xff]  ;;  %v87_v20 = vld [vmem:[%s336_s3 + $0x8] sm:$0xff] }
   0xa   :  { %167 = vmatpush.msra.mxu2 %v98_v8  ;;  %v86_v21 = vld [vmem:[%s336_s3] sm:$0xff] }
   0xb   :  { %108 = vmatpush.msra.mxu1 %v97_v10  ;;  %v184_v22 = vld [vmem:[%s335_s2] ss:$0 sm:$0xff] }
   0xc   :  { %168 = vmatpush.msra.mxu2 %v97_v10  ;;  %v185_v49 = vld [vmem:[%s337_s4] ss:$0 sm:$0xff]  ;;  %s218_s4 = smov 128  }
   0xd   :  { %109 = vmatpush.msra.mxu1 %v96_v11  ;;  %v102_v46 = vld [vmem:[#allocation2] sm:$0xff] }
   0xe   :  { %169 = vmatpush.msra.mxu2 %v96_v11  ;;  %v103_v52 = vld [vmem:[#allocation2 + $0x8] sm:$0xff] }
   0xf   :  { %110 = vmatpush.msra.mxu1 %v95_v12 }
  0x10   :  { %170 = vmatpush.msra.mxu2 %v95_v12 }
  0x11   :  { %163 = vmatmul.msk.f32.gmra.mxu0 %vm25_vm0, %v29_v9  ;;  %111 = vmatpush.msra.mxu1 %v94_v13 }
  0x12   :  { %171 = vmatpush.msra.mxu2 %v94_v13 }
  0x13   :  { %112 = vmatpush.msra.mxu1 %v93_v14 }
  0x14   :  { %172 = vmatpush.msra.mxu2 %v93_v14 }
  0x15   :  { %113 = vmatpush.msra.mxu1 %v92_v15 }
  0x16   :  { %173 = vmatpush.msra.mxu2 %v92_v15 }
  0x17   :  { %114 = vmatpush.msra.mxu1 %v91_v16 }
  0x18   :  { %174 = vmatpush.msra.mxu2 %v91_v16 }
  0x19   :  { %115 = vmatpush.msra.mxu1 %v90_v17 }
  0x1a   :  { %175 = vmatpush.msra.mxu2 %v90_v17 }
  0x1b   :  { %116 = vmatpush.msra.mxu1 %v89_v18 }
  0x1c   :  { %176 = vmatpush.msra.mxu2 %v89_v18 }
  0x1d   :  { %117 = vmatpush.msra.mxu1 %v88_v19 }
  0x1e   :  { %177 = vmatpush.msra.mxu2 %v88_v19 }
  0x1f   :  { %118 = vmatpush.msra.mxu1 %v87_v20 }
  0x20   :  { %178 = vmatpush.msra.mxu2 %v87_v20 }
  0x21   :  { %119 = vmatpush.msra.mxu1 %v86_v21 }
  0x22   :  { %179 = vmatpush.msra.mxu2 %v86_v21 }
  0x86   :  { %v62_v23 = vpop.f32.mrf.mxu0 }
  0x87   :  { %v63_v24 = vadd.f32 %v184_v22, %v62_v23 }
  0x89   :  { %v70_v26 = vmul.f32 0.044715, %v63_v24  ;;  %v68_v39 = vmul.f32 0.5, %v63_v24 }
  0x8b   :  { %v72_v27 = vmul.f32 %v70_v26, %v63_v24 }
  0x8d   :  { %v74_v28 = vmul.f32 %v72_v27, %v63_v24 }
  0x8e   :  { %v65_v29 = vpop.f32.mrf.mxu0 }
  0x8f   :  { %v66_v30 = vadd.f32 %v184_v22, %v65_v29  ;;  %v76_v31 = vadd.f32 %v74_v28, %v63_v24 }
  0x91   :  { %v78_v32 = vmul.f32 0.7978846, %v76_v31  ;;  %v71_v33 = vmul.f32 0.044715, %v66_v30  ;;  %v69_v43 = vmul.f32 0.5, %v66_v30 }
  0x93   :  { %186 = vtanh.f32 %v78_v32  ;;  %v73_v34 = vmul.f32 %v71_v33, %v66_v30 }
  0x95   :  { %v75_v35 = vmul.f32 %v73_v34, %v66_v30 }
  0x97   :  { %v77_v36 = vadd.f32 %v75_v35, %v66_v30 }
  0x99   :  { %v187_v37 = vpop.eup %186  ;;  %v79_v38 = vmul.f32 0.7978846, %v77_v36 }
  0x9a   :  { %v82_v40 = vadd.f32 1.0, %v187_v37 }
  0x9b   :  { %188 = vtanh.f32 %v79_v38 }
  0x9c   :  { %v84_v41 = vmul.f32 %v82_v40, %v68_v39 }
  0x9e   :  { %120 = vmatmul.f32.vlgmr.msra.gmra.mxu1 %v84_v41 }
  0xa1   :  { %v189_v42 = vpop.eup %188 }
  0xa2   :  { %v83_v44 = vadd.f32 1.0, %v189_v42 }
  0xa4   :  { %v85_v45 = vmul.f32 %v83_v44, %v69_v43 }
  0xa6   :  { %123 = vmatmul.f32.vlgmr.msra.gmra.mxu2 %v85_v45 }
 0x11b   :  { %v121_v47 = vpop.f32.mrf.mxu1 }
 0x11c   :  { %v127_v48 = vadd.f32 %v121_v47, %v102_v46 }
 0x11e   :  { %129 = vst.msk [vmem:[#allocation2] sm:$0xff] %vm25_vm0, %v127_v48 }
 0x125   :  { %v134_v50 = vld [vmem:[#allocation2] sm:$0xff] }
 0x126   :  { %v140_v51 = vadd.f32 %v185_v49, %v134_v50 }
 0x128   :  { %142 = vst.msk [vmem:[#allocation3] sm:$0xff] %vm25_vm0, %v140_v51 }
 0x129   :  { %v124_v53 = vpop.f32.mrf.mxu2 }
 0x12a   :  { %v128_v54 = vadd.f32 %v124_v53, %v103_v52 }
 0x12c   :  { %130 = vst.msk [vmem:[#allocation2 + $0x8] sm:$0xff] %vm25_vm0, %v128_v54 }
 0x133   :  { %v135_v55 = vld [vmem:[#allocation2 + $0x8] sm:$0xff] }
 0x134   :  { %v141_v56 = vadd.f32 %v185_v49, %v135_v55 }
 0x136   :  { %143 = vst.msk [vmem:[#allocation3 + $0x8] sm:$0xff] %vm25_vm0, %v141_v56 }
 0x137   :  { %156 = dma.vmem_to_hbm [thread:$0]  %s149_s12, 256, %s151_s15, [#allocation4], %s218_s4, %s218_s4, %s219_s16  }
 0x138   :  { %214 = dma.done.wait [#allocation4], 256  }
 0x139   :  { %215 = vsyncadd [#allocation4], 4294967040 }
 0x13a   :  { %161 = vsyncpa [#allocation4], 1 }

</bundles_post_ra>
